<compile_context>
chip_gen: v7x
topology: tpu7x:2x2x1
jax: 0.10.0
libtpu: 0.0.40
codegen_flags: <defaults>
</compile_context>

<pallas_src>
import jax
import jax.numpy as jnp
import numpy as np
from jax.experimental import pallas as pl
from jax.experimental.pallas import tpu as pltpu


def stdgi_kernel(xT_ref, xcT_ref, adjT_ref,
                 w1f_ref, b1f_ref,
                 wbw2_ref, bbw_ref,
                 bb_ref,
                 out_ref):
    """One batch element per grid step, feature-major layout.

    xT/xcT : [in_ft, N] f32        adjT : [N, N] bf16 (shared, resident)
    w1f    : [hidden, in_ft] bf16  b1f  : [hidden, 1] f32
    wbw2   : [in_ft, hidden] bf16  bbw  : [in_ft, 1] f32
    bb     : SMEM (1,) f32
    out    : [2, N] f32  (row 0 = disc(h, x), row 1 = disc(h, x_c))
    """
    xT = xT_ref[...]                        # [in_ft, N] f32
    adjT = adjT_ref[...]                    # [N, N] bf16

    # Folded Encoder.fc + GCN layer-1 linear:  p1 = W1' @ x^T + b1'
    p1 = jnp.dot(w1f_ref[...], xT.astype(jnp.bfloat16),
                 preferred_element_type=jnp.float32) + b1f_ref[...]
    # Propagation 1:  h1 = relu(adj @ .)^T = relu(p1 @ adj^T)
    h1 = jnp.maximum(
        jnp.dot(p1.astype(jnp.bfloat16), adjT,
                preferred_element_type=jnp.float32), 0.0)
    # Folded GCN layer-2 linear + bilinear weight:  q = (Wb^T W2) h1 + Wb^T b2
    q = jnp.dot(wbw2_ref[...], h1.astype(jnp.bfloat16),
                preferred_element_type=jnp.float32) + bbw_ref[...]
    # Propagation 2:  t = q @ adj^T  == (h @ Wb)^T, reused for x and x_c.
    t = jnp.dot(q.astype(jnp.bfloat16), adjT,
                preferred_element_type=jnp.float32)

    bb = bb_ref[0]
    # Sublane reductions land lane-dense; two full-row stores.
    out_ref[0:1, :] = jnp.sum(t * xT, axis=0, keepdims=True) + bb
    out_ref[1:2, :] = jnp.sum(t * xcT_ref[...], axis=0, keepdims=True) + bb


@jax.jit
def stdgi_forward(x, x_c, adj, params):
    B, N, in_ft = x.shape
    hidden = params["w1"].shape[0]

    # ---- Algebraic folds (exact; h is never an output) ----
    w1f = (params["w1"] @ params["wfc"]).astype(jnp.bfloat16)        # [hidden, in_ft]
    b1f = (params["w1"] @ params["bfc"] + params["b1"]).reshape(hidden, 1)
    wbw2 = (params["wb"][0].T @ params["w2"]).astype(jnp.bfloat16)   # [in_ft, hidden]
    bbw = (params["wb"][0].T @ params["b2"]).reshape(in_ft, 1)
    bb = params["bb"].reshape(1)                                     # 1-D SMEM scalar

    # Feature-major per-batch packing: xT[b, f, n] = x[b, n, f]
    xT = jnp.transpose(x, (0, 2, 1))                                 # [B, in_ft, N]
    xcT = jnp.transpose(x_c, (0, 2, 1))
    adjT = adj.T.astype(jnp.bfloat16)                                # shared [N, N]

    in_specs = [
        pl.BlockSpec((None, in_ft, N), lambda b: (b, 0, 0)),      # xT   (per batch)
        pl.BlockSpec((None, in_ft, N), lambda b: (b, 0, 0)),      # xcT  (per batch)
        pl.BlockSpec((N, N), lambda b: (0, 0)),                   # adjT (resident)
        pl.BlockSpec((hidden, in_ft), lambda b: (0, 0)),          # W1'
        pl.BlockSpec((hidden, 1), lambda b: (0, 0)),              # b1'
        pl.BlockSpec((in_ft, hidden), lambda b: (0, 0)),          # Wb^T W2
        pl.BlockSpec((in_ft, 1), lambda b: (0, 0)),               # Wb^T b2
        pl.BlockSpec(memory_space=pltpu.MemorySpace.SMEM),        # bilinear bias
    ]
    out_specs = pl.BlockSpec((None, 2, N), lambda b: (b, 0, 0))

    out3 = pl.pallas_call(
        stdgi_kernel,
        out_shape=jax.ShapeDtypeStruct((B, 2, N), jnp.float32),
        grid_spec=pltpu.PrefetchScalarGridSpec(
            num_scalar_prefetch=0,
            grid=(B,),                     # per-batch steps, pipelined
            in_specs=in_specs,
            out_specs=out_specs,
        ),
        compiler_params=pltpu.CompilerParams(
            dimension_semantics=("parallel",)),   # v7x: split batch over 2 TCs
    )(xT, xcT, adjT, w1f, b1f, wbw2, bbw, bb)

    # [B, 2, N] -> [B, N, 2]  (last dim = cat(disc(h, x), disc(h, x_c)))
    return jnp.transpose(out3, (0, 2, 1))


def stdgi_reference(x, x_c, adj, params):
    """Pure-JAX f32 reference of the unfolded forward pass (correctness check)."""
    x1 = x @ params["wfc"].T + params["bfc"]
    h1 = jnp.maximum(
        jnp.einsum("nm,bmf->bnf", adj, x1 @ params["w1"].T + params["b1"]), 0.0)
    h = jnp.einsum("nm,bmf->bnf", adj, h1 @ params["w2"].T + params["b2"])
    t = h @ params["wb"][0]
    r1 = jnp.sum(t * x, axis=-1, keepdims=True) + params["bb"][0]
    r2 = jnp.sum(t * x_c, axis=-1, keepdims=True) + params["bb"][0]
    return jnp.concatenate([r1, r2], axis=-1)


def init_params(key, in_ft, out_ft, hidden):
    ks = jax.random.split(key, 8)
    s = 0.1
    return {
        "wfc": s * jax.random.normal(ks[0], (in_ft, in_ft), jnp.float32),
        "bfc": s * jax.random.normal(ks[1], (in_ft,), jnp.float32),
        "w1": s * jax.random.normal(ks[2], (hidden, in_ft), jnp.float32),
        "b1": s * jax.random.normal(ks[3], (hidden,), jnp.float32),
        "w2": s * jax.random.normal(ks[4], (out_ft, hidden), jnp.float32),
        "b2": s * jax.random.normal(ks[5], (out_ft,), jnp.float32),
        "wb": s * jax.random.normal(ks[6], (1, out_ft, in_ft), jnp.float32),
        "bb": s * jax.random.normal(ks[7], (1,), jnp.float32),
    }


if __name__ == "__main__":
    B, N, IN_FT, OUT_FT, HIDDEN = 2, 16, 32, 32, 16

    key = jax.random.PRNGKey(0)
    k_x, k_adj, k_perm, k_p = jax.random.split(key, 4)

    x = jax.random.normal(k_x, (B, N, IN_FT), jnp.float32)
    # Symmetric row-normalized adjacency shared across the batch.
    a_raw = jnp.abs(jax.random.normal(k_adj, (N, N), jnp.float32))
    a_sym = a_raw + a_raw.T + jnp.eye(N, dtype=jnp.float32)
    adj = a_sym / jnp.sum(a_sym, axis=-1, keepdims=True)

    # corrupt(): permute the node axis (deterministic stand-in for np.random).
    idx = jax.random.permutation(k_perm, N)
    x_c = x[:, idx, :]

    params = init_params(k_p, IN_FT, OUT_FT, HIDDEN)

    out = stdgi_forward(x, x_c, adj, params)
    out = jax.block_until_ready(out)

    ref = stdgi_reference(x, x_c, adj, params)
    # bf16 MXU operands (per perf review) -> relaxed tolerance vs f32 reference.
    np.testing.assert_allclose(np.asarray(out), np.asarray(ref),
                               rtol=3e-2, atol=3e-2)
    assert out.shape == (B, N, 2)

    print("KERNEL_OK")
</pallas_src>

<mosaic_0001>
module attributes {stable_mosaic.version = 11 : i64} {
  func.func @stdgi_kernel(%arg0: i32, %arg1: memref<1x32x16xf32, #tpu.memory_space<vmem>>, %arg2: memref<1x32x16xf32, #tpu.memory_space<vmem>>, %arg3: memref<16x16xbf16, #tpu.memory_space<vmem>>, %arg4: memref<16x32xbf16, #tpu.memory_space<vmem>>, %arg5: memref<16x1xf32, #tpu.memory_space<vmem>>, %arg6: memref<32x16xbf16, #tpu.memory_space<vmem>>, %arg7: memref<32x1xf32, #tpu.memory_space<vmem>>, %arg8: memref<1xf32, #tpu.memory_space<smem>>, %arg9: memref<1x2x16xf32, #tpu.memory_space<vmem>>) attributes {dimension_semantics = [#tpu.dimension_semantics<parallel>], iteration_bounds = array<i64: 2>, scalar_prefetch = 0 : i64, scratch_operands = 0 : i64, tpu.core_type = #tpu.core_type<tc>, window_params = [{transform_indices = @transform_0, window_bounds = array<i64: 1, 32, 16>}, {transform_indices = @transform_1, window_bounds = array<i64: 1, 32, 16>}, {pipeline_mode = #tpu.pipeline_mode<synchronous>, transform_indices = @transform_2, window_bounds = array<i64: 16, 16>}, {pipeline_mode = #tpu.pipeline_mode<synchronous>, transform_indices = @transform_3, window_bounds = array<i64: 16, 32>}, {pipeline_mode = #tpu.pipeline_mode<synchronous>, transform_indices = @transform_4, window_bounds = array<i64: 16, 1>}, {pipeline_mode = #tpu.pipeline_mode<synchronous>, transform_indices = @transform_5, window_bounds = array<i64: 32, 16>}, {pipeline_mode = #tpu.pipeline_mode<synchronous>, transform_indices = @transform_6, window_bounds = array<i64: 32, 1>}, {transform_indices = @transform_7, window_bounds = array<i64: 1>}, {transform_indices = @transform_8, window_bounds = array<i64: 1, 2, 16>}]} {
    %c0 = arith.constant 0 : index
    %c0_0 = arith.constant 0 : index
    %c0_1 = arith.constant 0 : index
    %0 = vector.load %arg1[%c0, %c0_0, %c0_1] : memref<1x32x16xf32, #tpu.memory_space<vmem>>, vector<1x32x16xf32>
    %1 = vector.shape_cast %0 : vector<1x32x16xf32> to vector<32x16xf32>
    %c0_2 = arith.constant 0 : index
    %c0_3 = arith.constant 0 : index
    %2 = vector.load %arg3[%c0_2, %c0_3] : memref<16x16xbf16, #tpu.memory_space<vmem>>, vector<16x16xbf16>
    %c0_4 = arith.constant 0 : index
    %c0_5 = arith.constant 0 : index
    %3 = vector.load %arg4[%c0_4, %c0_5] : memref<16x32xbf16, #tpu.memory_space<vmem>>, vector<16x32xbf16>
    %4 = arith.truncf %1 : vector<32x16xf32> to vector<32x16xbf16>
    %cst = arith.constant dense<0.000000e+00> : vector<16x16xf32>
    %5 = tpu.matmul %3, %4, %cst {dimension_numbers = #tpu.dot_dimension_numbers<[1], [0], [0], [1], [0, 0, 1, 1], [], []>} : vector<16x32xbf16>, vector<32x16xbf16>, vector<16x16xf32> -> vector<16x16xf32>
    %c0_6 = arith.constant 0 : index
    %c0_7 = arith.constant 0 : index
    %6 = vector.load %arg5[%c0_6, %c0_7] : memref<16x1xf32, #tpu.memory_space<vmem>>, vector<16x1xf32>
    %7 = vector.broadcast %6 : vector<16x1xf32> to vector<16x16xf32>
    %8 = arith.addf %5, %7 : vector<16x16xf32>
    %9 = arith.truncf %8 : vector<16x16xf32> to vector<16x16xbf16>
    %cst_8 = arith.constant dense<0.000000e+00> : vector<16x16xf32>
    %10 = tpu.matmul %9, %2, %cst_8 {dimension_numbers = #tpu.dot_dimension_numbers<[1], [0], [0], [1], [0, 0, 1, 1], [], []>} : vector<16x16xbf16>, vector<16x16xbf16>, vector<16x16xf32> -> vector<16x16xf32>
    %cst_9 = arith.constant 0.000000e+00 : f32
    %11 = vector.broadcast %cst_9 : f32 to vector<16x16xf32>
    %12 = arith.maximumf %10, %11 : vector<16x16xf32>
    %c0_10 = arith.constant 0 : index
    %c0_11 = arith.constant 0 : index
    %13 = vector.load %arg6[%c0_10, %c0_11] : memref<32x16xbf16, #tpu.memory_space<vmem>>, vector<32x16xbf16>
    %14 = arith.truncf %12 : vector<16x16xf32> to vector<16x16xbf16>
    %cst_12 = arith.constant dense<0.000000e+00> : vector<32x16xf32>
    %15 = tpu.matmul %13, %14, %cst_12 {dimension_numbers = #tpu.dot_dimension_numbers<[1], [0], [0], [1], [0, 0, 1, 1], [], []>} : vector<32x16xbf16>, vector<16x16xbf16>, vector<32x16xf32> -> vector<32x16xf32>
    %c0_13 = arith.constant 0 : index
    %c0_14 = arith.constant 0 : index
    %16 = vector.load %arg7[%c0_13, %c0_14] : memref<32x1xf32, #tpu.memory_space<vmem>>, vector<32x1xf32>
    %17 = vector.broadcast %16 : vector<32x1xf32> to vector<32x16xf32>
    %18 = arith.addf %15, %17 : vector<32x16xf32>
    %19 = arith.truncf %18 : vector<32x16xf32> to vector<32x16xbf16>
    %cst_15 = arith.constant dense<0.000000e+00> : vector<32x16xf32>
    %20 = tpu.matmul %19, %2, %cst_15 {dimension_numbers = #tpu.dot_dimension_numbers<[1], [0], [0], [1], [0, 0, 1, 1], [], []>} : vector<32x16xbf16>, vector<16x16xbf16>, vector<32x16xf32> -> vector<32x16xf32>
    %c0_16 = arith.constant 0 : index
    %21 = memref.load %arg8[%c0_16] : memref<1xf32, #tpu.memory_space<smem>>
    %22 = arith.mulf %20, %1 : vector<32x16xf32>
    %cst_17 = arith.constant dense<0.000000e+00> : vector<16xf32>
    %23 = vector.multi_reduction <add>, %22, %cst_17 [0] : vector<32x16xf32> to vector<16xf32>
    %24 = vector.shape_cast %23 : vector<16xf32> to vector<1x16xf32>
    %25 = vector.broadcast %21 : f32 to vector<1x16xf32>
    %26 = arith.addf %24, %25 : vector<1x16xf32>
    %c0_18 = arith.constant 0 : index
    %c0_19 = arith.constant 0 : index
    %c0_20 = arith.constant 0 : index
    %27 = vector.load %arg9[%c0_18, %c0_19, %c0_20] : memref<1x2x16xf32, #tpu.memory_space<vmem>>, vector<1x1x16xf32>
    %28 = vector.shape_cast %27 : vector<1x1x16xf32> to vector<1x16xf32>
    %29 = vector.shape_cast %26 : vector<1x16xf32> to vector<1x1x16xf32>
    tpu.vector_store %arg9[%c0_18, %c0_19, %c0_20], %29 {strides = array<i32>} : memref<1x2x16xf32, #tpu.memory_space<vmem>>, vector<1x1x16xf32>,
    %c0_21 = arith.constant 0 : index
    %c0_22 = arith.constant 0 : index
    %c0_23 = arith.constant 0 : index
    %30 = vector.load %arg2[%c0_21, %c0_22, %c0_23] : memref<1x32x16xf32, #tpu.memory_space<vmem>>, vector<1x32x16xf32>
    %31 = vector.shape_cast %30 : vector<1x32x16xf32> to vector<32x16xf32>
    %32 = arith.mulf %20, %31 : vector<32x16xf32>
    %cst_24 = arith.constant dense<0.000000e+00> : vector<16xf32>
    %33 = vector.multi_reduction <add>, %32, %cst_24 [0] : vector<32x16xf32> to vector<16xf32>
    %34 = vector.shape_cast %33 : vector<16xf32> to vector<1x16xf32>
    %35 = vector.broadcast %21 : f32 to vector<1x16xf32>
    %36 = arith.addf %34, %35 : vector<1x16xf32>
    %c0_25 = arith.constant 0 : index
    %c1 = arith.constant 1 : index
    %c0_26 = arith.constant 0 : index
    %37 = vector.load %arg9[%c0_25, %c1, %c0_26] : memref<1x2x16xf32, #tpu.memory_space<vmem>>, vector<1x1x16xf32>
    %38 = vector.shape_cast %37 : vector<1x1x16xf32> to vector<1x16xf32>
    %39 = vector.shape_cast %36 : vector<1x16xf32> to vector<1x1x16xf32>
    tpu.vector_store %arg9[%c0_25, %c1, %c0_26], %39 {strides = array<i32>} : memref<1x2x16xf32, #tpu.memory_space<vmem>>, vector<1x1x16xf32>,
    return
  }
  func.func @transform_0(%arg0: i32) -> (i32, i32, i32) {
    %c0_i32 = arith.constant 0 : i32
    %c0_i32_0 = arith.constant 0 : i32
    %c0_i32_1 = arith.constant 0 : i32
    return %arg0, %c0_i32, %c0_i32_0 : i32, i32, i32
  }
  func.func @transform_1(%arg0: i32) -> (i32, i32, i32) {
    %c0_i32 = arith.constant 0 : i32
    %c0_i32_0 = arith.constant 0 : i32
    %c0_i32_1 = arith.constant 0 : i32
    return %arg0, %c0_i32, %c0_i32_0 : i32, i32, i32
  }
  func.func @transform_2(%arg0: i32) -> (i32, i32) {
    %c0_i32 = arith.constant 0 : i32
    %c0_i32_0 = arith.constant 0 : i32
    %c0_i32_1 = arith.constant 0 : i32
    return %c0_i32, %c0_i32_0 : i32, i32
  }
  func.func @transform_3(%arg0: i32) -> (i32, i32) {
    %c0_i32 = arith.constant 0 : i32
    %c0_i32_0 = arith.constant 0 : i32
    %c0_i32_1 = arith.constant 0 : i32
    return %c0_i32, %c0_i32_0 : i32, i32
  }
  func.func @transform_4(%arg0: i32) -> (i32, i32) {
    %c0_i32 = arith.constant 0 : i32
    %c0_i32_0 = arith.constant 0 : i32
    %c0_i32_1 = arith.constant 0 : i32
    return %c0_i32, %c0_i32_0 : i32, i32
  }
  func.func @transform_5(%arg0: i32) -> (i32, i32) {
    %c0_i32 = arith.constant 0 : i32
    %c0_i32_0 = arith.constant 0 : i32
    %c0_i32_1 = arith.constant 0 : i32
    return %c0_i32, %c0_i32_0 : i32, i32
  }
  func.func @transform_6(%arg0: i32) -> (i32, i32) {
    %c0_i32 = arith.constant 0 : i32
    %c0_i32_0 = arith.constant 0 : i32
    %c0_i32_1 = arith.constant 0 : i32
    return %c0_i32, %c0_i32_0 : i32, i32
  }
  func.func @transform_7(%arg0: i32) -> i32 {
    %c0_i32 = arith.constant 0 : i32
    %c0_i32_0 = arith.constant 0 : i32
    return %c0_i32 : i32
  }
  func.func @transform_8(%arg0: i32) -> (i32, i32, i32) {
    %c0_i32 = arith.constant 0 : i32
    %c0_i32_0 = arith.constant 0 : i32
    %c0_i32_1 = arith.constant 0 : i32
    return %arg0, %c0_i32, %c0_i32_0 : i32, i32, i32
  }
}

</mosaic_0001>

<bundles_post_ra>
// kernel: stdgi_forward.1
= control target key start
LH: loop header
LB: loop body
LE: loop exit
PB: predicated region body
PF: predicated region fallthrough
CT: control target
= control target key end

     0   :  { %s1128_s0 = inlined_call_operand.vmem [shape: f32[2,32,16], index: 0, kind: input, shape index: {}]   ;;  %s1129_s1 = inlined_call_operand.vmem [shape: f32[2,32,16], index: 1, kind: input, shape index: {}]   ;;  %s1130_s2 = inlined_call_operand.vmem [shape: bf16[16,16], index: 2, kind: input, shape index: {}]   ;;  %s1131_s3 = inlined_call_operand.vmem [shape: bf16[16,32], index: 3, kind: input, shape index: {}]   ;;  %s1132_s4 = inlined_call_operand.vmem [shape: f32[16,1], index: 4, kind: input, shape index: {}]   ;;  %s1133_s5 = inlined_call_operand.vmem [shape: bf16[32,16], index: 5, kind: input, shape index: {}]   ;;  %s1134_s6 = inlined_call_operand.vmem [shape: f32[32,1], index: 6, kind: input, shape index: {}]   ;;  %s1135_s7 = inlined_call_operand.<no memory space> [shape: f32[1], index: 7, kind: input, shape index: {}]   ;;  %s1136_s8 = inlined_call_operand.hbm [shape: f32[2,2,16], index: 8, kind: output, shape index: {}]  }
   0x1   :  { %13 = sst [smem:[#allocation2]] %s1135_s7 }
   0x2   :  { %14 = vsyncpa [#allocation4], 0 }
   0x3   :  { %16 = vsyncpa [#allocation4 + $0x1], 0  ;;  %s959_s29 = smov 0   ;;  %s961_s30 = smov 0  }
   0x4   :  { %s963_s9 = smov 0   ;;  %s965_s10 = smov 0  }
   0x5 LB: > { %s980_s7 = sadd.s32 4294967295, %s905_s10   ;;  %s733_s11 = sadd.s32 4294967294, %s905_s10   ;;  %s905_s10 = sphi %s965_s10, %s1142_s10   ;;  %s901_s9 = sphi %s963_s9, %s1141_s9   ;;  %s897_s30 = sphi %s961_s30, %s1140_s30   ;;  %s893_s29 = sphi %s959_s29, %s1139_s29  }
   0x6   : > { %s984_s12 = sadd.s32 1, %s905_s10   ;;  %s207_s13 = sadd.s32 1, %s901_s9 }
   0x7   : > { %s204_s14 = ssub.s32 %s905_s10, %s984_s12  ;;  %p217_p0 = scmp.ne.s32.totalorder %s901_s9, %s897_s30 }
   0x8   : > { %p205_p1 = scmp.eq.s32.totalorder %s204_s14, 0  ;;  %p218_p2 = scmp.eq.s32.totalorder %s980_s7, 1 }
   0x9   : > { %p223_p3 = scmp.ne.s32.totalorder %s897_s30, %s893_s29  ;;  %p224_p4 = scmp.eq.s32.totalorder %s733_s11, 1 }
   0xa   : > { %s995_s15 = scalar_select %p205_p1, %s901_s9, %s207_s13  }
   0xb   : > { %p997_p5 = por %p218_p2, %p217_p0  ;;  %p1001_p6 = por %p224_p4, %p223_p3 }
   0xc   : > { %p736_p7 = scmp.ge.s32.totalorder %s905_s10, 1  ;;  %p276_p8 = scmp.lt.s32.totalorder %s905_s10, 3 }
   0xe   : > { %p277_p9 = pnand %p736_p7, %p276_p8 }
   0xf   : > { %p315_p10 = scmp.lt.s32.totalorder (!%p277_p9), %s980_s7, 1  ;;  %v907_v0 = vmov (!%p277_p9), 0.0   ;;  %vm908_vm0 = vmmov (!%p277_p9), 0   ;;  %v336_v1 = vld [vmem:[%s1132_s4] sm:$0xff] (!%p277_p9)  ;;  %v909_v2 = vmov (!%p277_p9), 0   ;;  %v337_v3 = vld [vmem:[%s1132_s4 + $0x8] sm:$0xff] (!%p277_p9) }
  0x10   : > { %280 = sbr.rel (%p277_p9) target bundleno = 949 (0x3b5), region = 52  ;;  %769 = vmatprep.subr.bf16.mxu0 (!%p277_p9), %v907_v0  ;;  %773 = vmatprep.mubr.msk.bf16.mxu0 (!%p277_p9), %vm908_vm0, %v907_v0  ;;  %v459_v9 = vld [vmem:[%s1134_s6 + $0x10] sm:$0xff] (!%p277_p9)  ;;  %v839_v11 = vld [vmem:[%s1131_s3] sm:$0xff] (!%p277_p9)   ;;  %vm353_vm1 = vcmask (!%p277_p9), 261120   ;;  %vm405_vm2 = vcmask (!%p277_p9), 130048   ;;  %v458_v24 = vld [vmem:[%s1134_s6 + $0x8] sm:$0xff] (!%p277_p9) }
  0x11   : > { %837 = vset.pattern.permute.xlu0 (!%p277_p9), %v909_v2  ;;  %777 = vmatprep.subr.bf16.mxu1 (!%p277_p9), %v907_v0  ;;  %v840_v12 = vld [vmem:[%s1130_s2] sm:$0xff] (!%p277_p9)   ;;  %v460_v25 = vld [vmem:[%s1134_s6 + $0x18] sm:$0xff] (!%p277_p9)  ;;  %v842_v33 = vld [vmem:[%s1133_s5 + $0x8] sm:$0xff] (!%p277_p9)   ;;  %s753_s23 = sshll.u32 (!%p277_p9), %s980_s7, 5  ;;  %vm623_vm3 = vcmask (!%p277_p9), 122880   ;;  %s910_s13 = smov (!%p277_p9), [#allocation3]  }
  0x12   : > { %340 = vperm.xlu0 (!%p277_p9), %837, %v336_v1   ;;  %779 = vmatprep.mubr.msk.bf16.mxu1 (!%p277_p9), %vm908_vm0, %v907_v0  ;;  %v841_v22 = vld [vmem:[%s1133_s5] sm:$0xff] (!%p277_p9)   ;;  %s1086_s28 = scalar_lea.hbm (!%p277_p9), %s1136_s8, %s753_s23  ;;  %s847_s14 = sshll.u32 (!%p277_p9), %s910_s13, 4  ;;  %s848_s14 = int_to_ptr.vmem [resolvable:$false] %s847_s14 }
  0x13   : > { %838 = vset.pattern.permute.xlu1 (!%p277_p9), %v909_v2  ;;  %778 = vmatpush3.bf16.msra.mxu1 (!%p277_p9), %v840_v12  ;;  %v457_v23 = vld [vmem:[%s1134_s6] sm:$0xff] (!%p277_p9)  ;;  %s849_s18 = scalar_lea.vmem (!%p277_p9), %s848_s14, 64 }
  0x14   : > { %463 = vperm.xlu1 (!%p277_p9), %838, %v457_v23  }
  0x16   : > { %345 = vperm.xlu0 (!%p277_p9), %837, %v337_v3  }
  0x17   : > { %s1012_s20 = scalar_select %p315_p10, %s980_s7, 1 }
  0x18   : > { %468 = vperm.xlu1 %838, %v458_v24  }
  0x19   : > { %s756_s21 = sshll.u32 %s1012_s20, 5  ;;  %s312_s20 = sand.u32 1, %s897_s30  }
  0x1a   : > { %s319_s26 = scalar_lea.vmem %s1128_s0, %s756_s21  ;;  %473 = vperm.xlu0 %837, %v459_v9   ;;  %s324_s19 = scalar_lea.vmem %s1129_s1, %s756_s21 }
  0x1b   : > { %v1023_v4 = vld [vmem:[%s319_s26] sm:$0xff]  ;;  %v1025_v5 = vld [vmem:[%s319_s26 + $0x8] sm:$0xff]  ;;  %v1027_v6 = vld [vmem:[%s319_s26 + $0x10] sm:$0xff]  ;;  %s603_s21 = sld [smem:[#allocation2]]  ;;  %s737_s22 = sshll.u32 %s312_s20, 1 }
  0x1c   : > { %v334_v7 = vpack.c.bf16 %v1025_v5, %v1023_v4  ;;  %v1031_v8 = vld [vmem:[%s319_s26 + $0x18] sm:$0xff]  ;;  %478 = vperm.xlu1 %838, %v460_v25   ;;  %v625_v48 = vld [vmem:[%s324_s19] sm:$0xff]  ;;  %v627_v50 = vld [vmem:[%s324_s19 + $0x10] sm:$0xff]  ;;  %s314_s24 = scalar_lea.vmem [#allocation3], %s737_s22  ;;  %s649_s7 = scalar_lea.sflag [#allocation4], %s312_s20 }
  0x1d   : > { %v335_v10 = vpack.c.bf16 %v1031_v8, %v1027_v6  ;;  %v626_v52 = vld [vmem:[%s324_s19 + $0x8] sm:$0xff]  ;;  %v628_v56 = vld [vmem:[%s324_s19 + $0x18] sm:$0xff]  ;;  %s662_s25 = sshll.u32 %s314_s24, 4  ;;  %s1088_s25 = int_to_ptr.vmem [resolvable:$true] %s662_s25 }
  0x1e   : > { %770 = vmatpush3.bf16.msra.mxu0 %v334_v7  ;;  %s843_s11 = scalar_lea.vmem %s1088_s25, 32  ;;  %p850_p0 = scmp.lt.s32.totalorder %s1088_s25, %s848_s14 }
  0x1f   : > { %771 = vmatprep.subr.bf16.mxu0 %v907_v0  ;;  %p844_p11 = scmp.ne.s32.totalorder %s1088_s25, %s843_s11  ;;  %p851_p1 = scmp.lt.s32.totalorder %s849_s18, %s843_s11 }
  0x21   : > { %v621_v24 = vstv %s603_s21  ;;  %p845_p12 = pnand %p844_p11, %p997_p5  ;;  %p852_p2 = por %p851_p1, %p850_p0 }
  0x22   : > { %772 = vmatpush3.bf16.msra.mxu0 %v335_v10 }
  0x23   : > { %789 = vmatprep.subr.bf16.mxu0 %v840_v12  ;;  %p846_p13 = pneg %p845_p12 }
  0x25   : > { %774 = vmatmul.mubr.msk.bf16.vlgmr.msra.gmra.mrb[0].mxu0 %vm353_vm1, %v839_v11  ;;  %p853_p3 = pnand %p852_p2, %p846_p13 }
  0x26   : > { %790 = vmatpush3.bf16.msra.mxu0 %v840_v12 }
  0x91   : > { %v341_v13 = vpop.permute.xlu0 %340 }
  0x93   : > { %v464_v34 = vpop.permute.xlu1 %463 }
  0x95   : > { %v346_v16 = vpop.permute.xlu0 %345 }
  0x97   : > { %v469_v35 = vpop.permute.xlu1 %468 }
  0x99   : > { %v474_v37 = vpop.permute.xlu0 %473 }
  0x9b   : > { %v479_v39 = vpop.permute.xlu1 %478 }
  0xf8   : > { %v391_v14 = vpop.f32.mrb[0].mxu0 }
  0xf9   : > { %v775_v15 = vpop.f32.mrb[1].mxu0  ;;  %v392_v18 = vadd.f32 %v391_v14, %v341_v13 }
  0xfa   : > { %v394_v17 = vpop.f32.mrb[2].mxu0 }
  0xfb   : > { %v395_v19 = vadd.f32 %v394_v17, %v346_v16  ;;  %v776_v20 = vpop.f32.mrb[3].mxu0 }
  0xfd   : > { %v398_v21 = vpack.c.bf16 %v395_v19, %v392_v18 }
  0xff   : > { %780 = vmatmul.mubr.msk.bf16.vlgmr.msra.gmra.mrb[0].mxu1 %vm405_vm2, %v398_v21 }
 0x100   : > { %785 = vmatprep.mubr.msk.bf16.mxu1 %vm405_vm2, %v841_v22 }
 0x1d2   : > { %v443_v26 = vpop.f32.mrb[0].mxu1 }
 0x1d3   : > { %v781_v27 = vpop.f32.mrb[1].mxu1  ;;  %v450_v29 = vmax.f32 %v443_v26, 0.0 }
 0x1d4   : > { %v446_v28 = vpop.f32.mrb[2].mxu1 }
 0x1d5   : > { %v451_v30 = vmax.f32 %v446_v28, 0.0  ;;  %v782_v31 = vpop.f32.mrb[3].mxu1 }
 0x1d7   : > { %v456_v32 = vpack.c.bf16 %v451_v30, %v450_v29 }
 0x1d9   : > { %783 = vmatprep.subr.bf16.mxu1 %v456_v32 }
 0x1da   : > { %784 = vmatpush3.bf16.msra.mxu1 %v456_v32 }
 0x1dd   : > { %786 = vmatmul.mubr.msk.bf16.vlgmr.msra.gmra.mrb[4].mxu1 %vm405_vm2, %v842_v33 }
 0x2b0   : > { %v787_v36 = vpop.f32.mrb[4].mxu1 }
 0x2b1   : > { %v531_v38 = vpop.f32.mrb[5].mxu1  ;;  %v540_v41 = vadd.f32 %v787_v36, %v474_v37 }
 0x2b2   : > { %v788_v40 = vpop.f32.mrb[6].mxu1  ;;  %v532_v44 = vadd.f32 %v531_v38, %v464_v34 }
 0x2b3   : > { %v543_v42 = vadd.f32 %v788_v40, %v479_v39  ;;  %v534_v43 = vpop.f32.mrb[7].mxu1 }
 0x2b4   : > { %v535_v45 = vadd.f32 %v534_v43, %v469_v35 }
 0x2b5   : > { %v547_v46 = vpack.c.bf16 %v543_v42, %v540_v41 }
 0x2b6   : > { %v546_v47 = vpack.c.bf16 %v535_v45, %v532_v44 }
 0x2b8   : > { %791 = vmatprep.mubr.msk.bf16.mxu0 %vm405_vm2, %v546_v47 }
 0x2b9   : > { %792 = vmatmul.mubr.msk.bf16.vlgmr.msra.gmra.mrb[4].mxu0 %vm405_vm2, %v547_v46 }
 0x38c   : > { %v793_v49 = vpop.f32.mrb[4].mxu0 }
 0x38d   : > { %v588_v51 = vpop.f32.mrb[5].mxu0  ;;  %v606_v58 = vmul.f32 %v793_v49, %v1027_v6  ;;  %v631_v59 = vmul.f32 %v793_v49, %v627_v50 }
 0x38e   : > { %v604_v53 = vmul.f32 %v588_v51, %v1023_v4  ;;  %v629_v54 = vmul.f32 %v625_v48, %v588_v51  ;;  %v794_v55 = vpop.f32.mrb[6].mxu0 }
 0x38f   : > { %v591_v57 = vpop.f32.mrb[7].mxu0  ;;  %v607_v62 = vmul.f32 %v794_v55, %v1031_v8  ;;  %v632_v63 = vmul.f32 %v794_v55, %v628_v56  ;;  %v611_v6 = vsel %vm405_vm2, %v606_v58, 0.0  ;;  %v636_v9 = vsel %vm405_vm2, %v631_v59, 0.0 }
 0x390   : > { %v605_v60 = vmul.f32 %v591_v57, %v1025_v5  ;;  %v630_v61 = vmul.f32 %v626_v52, %v591_v57  ;;  %v608_v0 = vsel %vm405_vm2, %v604_v53, 0.0  ;;  %v633_v1 = vsel %vm405_vm2, %v629_v54, 0.0 }
 0x391   : > { %v613_v8 = vsel %vm405_vm2, %v607_v62, 0.0  ;;  %v638_v11 = vsel %vm405_vm2, %v632_v63, 0.0 }
 0x392   : > { %v609_v2 = vsel %vm405_vm2, %v605_v60, 0.0  ;;  %v634_v3 = vsel %vm405_vm2, %v630_v61, 0.0 }
 0x393   : > { %v610_v4 = vadd.f32 %v609_v2, %v608_v0  ;;  %v635_v7 = vadd.f32 %v634_v3, %v633_v1 }
 0x395   : > { %v612_v5 = vadd.f32 %v611_v6, %v610_v4  ;;  %v637_v10 = vadd.f32 %v636_v9, %v635_v7 }
 0x397   : > { %v614_v12 = vadd.f32 %v613_v8, %v612_v5  ;;  %v639_v13 = vadd.f32 %v638_v11, %v637_v10 }
 0x399   : > { %v615_v14 = vrot.slane %v614_v12, 4  ;;  %v640_v15 = vrot.slane %v639_v13, 4 }
 0x39b   : > { %v616_v16 = vadd.f32 %v615_v14, %v614_v12  ;;  %v641_v17 = vadd.f32 %v640_v15, %v639_v13 }
 0x39d   : > { %v617_v18 = vrot.slane %v616_v16, 2  ;;  %v642_v19 = vrot.slane %v641_v17, 2 }
 0x39f   : > { %v618_v20 = vadd.f32 %v617_v18, %v616_v16  ;;  %v643_v21 = vadd.f32 %v642_v19, %v641_v17 }
 0x3a1   : > { %v619_v22 = vrot.slane %v618_v20, 1  ;;  %v644_v23 = vrot.slane %v643_v21, 1 }
 0x3a3   : > { %v620_v25 = vadd.f32 %v619_v22, %v618_v20  ;;  %v645_v26 = vadd.f32 %v644_v23, %v643_v21 }
 0x3a5   : > { %v622_v27 = vadd.f32 %v621_v24, %v620_v25  ;;  %v646_v28 = vadd.f32 %v645_v26, %v621_v24 }
 0x3a7   : > { %624 = vst.msk [vmem:[%s314_s24] sm:$0x1] %vm623_vm3, %v622_v27  ;;  %647 = vst.msk [vmem:[%s314_s24 + $0x1] sm:$0x1] %vm623_vm3, %v646_v28 }
 0x3a8   : > { %856 = shalt.err (!%p853_p3)
}
 0x3a9   : > { %s857_s19 = scalar_lea.hbm %s1086_s28, 32  ;;  %s861_s22 = scalar_lea.hbm %s1136_s8, 64 }
 0x3aa   : > { %p858_p4 = scmp.ne.s32.totalorder %s1086_s28, %s857_s19  ;;  %p862_p9 = scmp.lt.u32.totalorder %s1086_s28, %s1136_s8 }
 0x3ab   : > { %p863_p10 = scmp.lt.u32.totalorder %s861_s22, %s857_s19  ;;  %p865_p12 = scmp.lt.u32.totalorder %s857_s19, %s1086_s28 }
 0x3ac   : > { %p859_p7 = pnand %p858_p4, %p997_p5 }
 0x3ad   : > { %p864_p11 = por %p863_p10, %p862_p9 }
 0x3ae   : > { %p860_p8 = pneg %p859_p7 }
 0x3af   : > { %p866_p13 = por %p865_p12, %p864_p11 }
 0x3b1   : > { %p867_p0 = pnand %p866_p13, %p860_p8 }
 0x3b3   : > { %870 = shalt.err (!%p867_p0)
}
 0x3b4   : > { %795 = dma.vmem_to_hbm [thread:$0]  (%p997_p5), %s1088_s25, 32, %s1086_s28, %s649_s7  }
 0x3b5 PF: > { %p801_p1 = scmp.ge.s32.totalorder %s905_s10, 2  ;;  %s674_s26 = sand.u32 1, %s893_s29  }
 0x3b6   : > { %s675_s27 = scalar_lea.sflag [#allocation4], %s674_s26 }
 0x3b7   : > { %p798_p2 = pnand %p801_p1, %p1001_p6 }
 0x3b9   : > { %888 = dma.done.wait (!%p798_p2), %s675_s27, 32  }
 0x3ba   : > { %890 = vsyncadd (!%p798_p2), %s675_s27, 4294967264  ;;  %p19_p3 = scmp.ge.s32.totalorder %s984_s12, 4   ;;  %s1139_s29 = smov %s897_s30 }
 0x3bb   : > { %s1140_s30 = smov %s901_s9  ;;  %s1141_s9 = smov %s995_s15 }
 0x3bc   : > { %s1142_s10 = smov %s984_s12  ;;  %21 = sbr.rel (!%p19_p3) target bundleno = 5 (0x5), region = 90 }
 0x3c3   :  { %680 = vsyncpa [#allocation4], 1 }
 0x3c4   :  { %682 = vsyncpa [#allocation4 + $0x1], 1 }

</bundles_post_ra>
